<compile_context>
chip_gen: v6e
topology: v6e:2x2x1
jax: 0.10.0
libtpu: 0.0.40
codegen_flags: <defaults>
</compile_context>

<pallas_src>
import math
import functools

import numpy as np
import jax
import jax.numpy as jnp
from jax.experimental import pallas as pl
from jax.experimental.pallas import tpu as pltpu


# ----------------------------- configuration -------------------------------
BATCH       = 8
STATE_DIM   = 16
ACTION_DIM  = 8
T_DIM       = 16      # sinusoidal time-embedding dim of the MLP model
HIDDEN      = 32      # hidden width of the MLP model
N_TIMESTEPS = 5
MAX_ACTION  = 1.0
BC_COEF     = 0.6     # != 0  ->  model output is used as x_recon directly

# --------- packed parameter slab layout (rows, all sublane-aligned) ---------
ROW_W1X   = 0                       # (ACTION_DIM, HIDDEN)    rows  0:8
ROW_W2    = ROW_W1X + ACTION_DIM    # (HIDDEN, HIDDEN)        rows  8:40
ROW_B2    = ROW_W2 + HIDDEN         # (1, HIDDEN) at row 40   rows 40:48 (padded)
ROW_W3    = ROW_B2 + 8              # (HIDDEN, ACTION_DIM)    rows 48:80 (cols 0:8)
ROW_B3    = ROW_W3 + HIDDEN         # (1, ACTION_DIM) row 80  rows 80:88 (padded)
SLAB_ROWS = ROW_B3 + 8              # 88


# -------------------------- diffusion schedule (glue) ----------------------
def vp_beta_schedule(timesteps):
    t = np.arange(1, timesteps + 1, dtype=np.float64)
    T = timesteps
    b_max, b_min = 10.0, 0.1
    alpha = np.exp(-b_min / T - 0.5 * (b_max - b_min) * (2 * t - 1) / T ** 2)
    return (1.0 - alpha).astype(np.float64)


def make_schedule_coeffs(n_timesteps):
    """Per reverse step s (true timestep t = n_timesteps-1-s) return Python floats
       (posterior_mean_coef1[t], posterior_mean_coef2[t],
        nonzero_mask(t) * exp(0.5 * posterior_log_variance_clipped[t])).
       Pure host numpy -> baked into the kernel as compile-time constants."""
    betas = vp_beta_schedule(n_timesteps)
    alphas = 1.0 - betas
    ac = np.cumprod(alphas)
    ac_prev = np.concatenate([[1.0], ac[:-1]])

    posterior_variance = betas * (1.0 - ac_prev) / (1.0 - ac)
    post_log_var = np.log(np.clip(posterior_variance, 1e-20, None))
    c1 = betas * np.sqrt(ac_prev) / (1.0 - ac)
    c2 = (1.0 - ac_prev) * np.sqrt(alphas) / (1.0 - ac)
    sigma = np.exp(0.5 * post_log_var)

    rows = []
    for i in reversed(range(n_timesteps)):
        nz = 0.0 if i == 0 else 1.0
        rows.append((float(c1[i]), float(c2[i]), float(nz * sigma[i])))
    return tuple(rows)   # tuple of (c1, c2, sigma) Python floats, reverse order


# ----------------------- MLP model parameters (glue) ------------------------
def mish_jnp(x):
    return x * jnp.tanh(jax.nn.softplus(x))


def init_params(key):
    ks = jax.random.split(key, 10)
    def lin(k, fan_in, fan_out):
        return (jax.random.normal(k, (fan_in, fan_out), jnp.float32)
                / np.sqrt(fan_in)).astype(jnp.float32)
    return dict(
        # time-embedding MLP (computed once per timestep in glue)
        wt1=lin(ks[0], T_DIM, 2 * T_DIM), bt1=jnp.zeros((2 * T_DIM,), jnp.float32),
        wt2=lin(ks[1], 2 * T_DIM, T_DIM), bt2=jnp.zeros((T_DIM,), jnp.float32),
        # noise-prediction MLP; first-layer weight split over concat([x, t_emb, state])
        # so no in-kernel concatenation is needed.
        w1x=lin(ks[2], ACTION_DIM, HIDDEN),
        w1t=lin(ks[3], T_DIM, HIDDEN),
        w1s=lin(ks[4], STATE_DIM, HIDDEN),
        b1=jnp.zeros((1, HIDDEN), jnp.float32),
        w2=lin(ks[5], HIDDEN, HIDDEN),
        b2=jnp.zeros((1, HIDDEN), jnp.float32),
        w3=lin(ks[6], HIDDEN, ACTION_DIM),
        b3=jnp.zeros((1, ACTION_DIM), jnp.float32),
    )


def time_embeddings(params, n_timesteps):
    """Sinusoidal pos-emb + small MLP for t = n_timesteps-1 .. 0. -> (T, T_DIM)"""
    ts = np.array(list(reversed(range(n_timesteps))), dtype=np.float32)
    half = T_DIM // 2
    freqs = np.exp(np.arange(half, dtype=np.float32) * -(math.log(10000.0) / (half - 1)))
    ang = ts[:, None] * freqs[None, :]
    emb = jnp.asarray(np.concatenate([np.sin(ang), np.cos(ang)], axis=-1))  # (T, T_DIM)
    h = mish_jnp(emb @ params["wt1"] + params["bt1"])
    return (h @ params["wt2"] + params["bt2"]).astype(jnp.float32)          # (T, T_DIM)


def pack_param_slab(params):
    """Pack w1x / w2 / b2 / w3 / b3 into one (88, 32) f32 slab (one DMA instead of
       five).  All blocks start on 8-row (sublane-tile) boundaries."""
    H, A = HIDDEN, ACTION_DIM
    blocks = [
        params["w1x"],                                                   # rows  0:8
        params["w2"],                                                    # rows  8:40
        jnp.concatenate([params["b2"],
                         jnp.zeros((7, H), jnp.float32)], axis=0),       # rows 40:48
        params["w3"] if A == H else
        jnp.pad(params["w3"], ((0, 0), (0, 0))),                         # rows 48:80 (cols 0:A)
        jnp.concatenate([params["b3"],
                         jnp.zeros((7, A), jnp.float32)], axis=0),       # rows 80:88 (cols 0:A)
    ]
    # pad the narrow (cols 0:A) blocks out to HIDDEN columns
    blocks = [b if b.shape[1] == H else jnp.pad(b, ((0, 0), (0, H - b.shape[1])))
              for b in blocks]
    return jnp.concatenate(blocks, axis=0).astype(jnp.float32)           # (88, 32)


# ------------------------------- Pallas kernel ------------------------------
def diffusion_kernel(x_noise_ref, bias1_ref, slab_ref, out_ref, *,
                     max_action, coef_rows):
    # Load the tiny weights once from the packed slab (static, sublane-aligned
    # windows); they stay vreg/VMEM-resident for the whole unrolled loop.
    w1x = slab_ref[ROW_W1X:ROW_W1X + ACTION_DIM, :]          # (A, HIDDEN)
    w2  = slab_ref[ROW_W2:ROW_W2 + HIDDEN, :]                # (HIDDEN, HIDDEN)
    b2  = slab_ref[ROW_B2:ROW_B2 + 1, :]                     # (1, HIDDEN)
    w3  = slab_ref[ROW_W3:ROW_W3 + HIDDEN, 0:ACTION_DIM]     # (HIDDEN, A)
    b3  = slab_ref[ROW_B3:ROW_B3 + 1, 0:ACTION_DIM]          # (1, A)

    def mish(v):
        # mish(v) = v * tanh(softplus(v)) = v * u / (u + 2),  u = e*(e+2), e = exp(v)
        # One EUP exp + one approx EUP reciprocal instead of exp->log1p->tanh.
        # exp input clamped at 20 (u/(u+2) == 1 to f32 precision beyond that), so
        # mish(v) ~= v is preserved for large v and nothing overflows.
        e = jnp.exp(jnp.minimum(v, 20.0))
        u = e * (e + 2.0)
        return v * u * pl.reciprocal(u + 2.0, approx=True)

    n_timesteps = len(coef_rows)
    x = x_noise_ref[0]                                       # initial x ~ N(0, I)

    # Entire reverse-diffusion loop, statically unrolled (T is a Python int), so
    # bias1_ref[t] / x_noise_ref[t+1] are compile-time slices and the schedule
    # coefficients are immediate constants — nothing but the MLP sits on the
    # serial dependence chain.
    # TODO(synk): if bundle dump shows per-step RHS re-pushes, stage w1x/w2/w3 in
    # the MXU via pltpu.matmul_push_rhs/matmul_acc_lhs/matmul_pop (hold RHS
    # across the 5 steps); and consider doing the tiny x@w1x (M=8,K=8) on the VPU.
    for t in range(n_timesteps):
        c1, c2, sigma = coef_rows[t]

        # noise-prediction MLP: step-invariant first-layer contributions
        # (temb[t] @ w1t + state @ w1s + b1) were hoisted into bias1[t].
        h = mish(jnp.dot(x, w1x, preferred_element_type=jnp.float32) + bias1_ref[t])
        h = mish(jnp.dot(h, w2, preferred_element_type=jnp.float32) + b2)
        eps = jnp.dot(h, w3, preferred_element_type=jnp.float32) + b3

        # bc_coef != 0  ->  model output IS x_recon; clip_denoised=True clamp.
        x_recon = jnp.clip(eps, -max_action, max_action)

        # q_posterior mean + reparameterised sampling step; the noise term is
        # elided at trace time on the final step (nonzero_mask == 0 at t == 0).
        x = c1 * x_recon + c2 * x
        if sigma != 0.0:
            x = x + sigma * x_noise_ref[t + 1]

    # final clamp from `sample()`; single store of the observed result.
    out_ref[...] = jnp.clip(x, -max_action, max_action)


# --------------------------------- wrapper ----------------------------------
def diffusion_sample(state, x_init, step_noise, coef_rows, tembs, params,
                     *, max_action=MAX_ACTION):
    B, A = x_init.shape
    T = len(coef_rows)

    # Hoist step-invariant first-layer matmuls out of the serial per-step path:
    #   bias1[t] = temb[t] @ w1t + state @ w1s + b1        -> (T, B, HIDDEN)
    bias1 = ((tembs @ params["w1t"])[:, None, :]
             + (state @ params["w1s"] + params["b1"])[None, :, :]).astype(jnp.float32)

    # Pack x_init with the per-step noise (one input DMA instead of two), and
    # the five tiny weights/biases into one slab (one DMA instead of five).
    x_noise = jnp.concatenate([x_init[None], step_noise], axis=0)  # (T+1, B, A)
    slab = pack_param_slab(params)                                 # (88, HIDDEN)

    kernel = functools.partial(diffusion_kernel,
                               max_action=max_action, coef_rows=coef_rows)

    vmem = pl.BlockSpec(memory_space=pltpu.MemorySpace.VMEM)

    # Single gridless invocation: everything (a few KB) is VMEM-resident, so
    # there is no per-timestep grid/DMA overhead at all.
    # TODO(synk): for multi-sample / multi-env throughput (esp. v7x's 2 TCs), add
    # an independent leading grid axis marked "parallel" and size per-block M to
    # >=256 (v6e/v7x) / >=128 (v5e) to actually fill the MXU.
    return pl.pallas_call(
        kernel,
        out_shape=jax.ShapeDtypeStruct((B, A), jnp.float32),
        in_specs=[
            vmem,   # x_noise (T+1, B, A)   : [x_init; per-step noise]
            vmem,   # bias1   (T, B, HIDDEN): precomputed first-layer bias
            vmem,   # slab    (88, HIDDEN)  : packed w1x | w2 | b2 | w3 | b3
        ],
        out_specs=vmem,
    )(x_noise, bias1, slab)


# ----------------------------------- main ------------------------------------
if __name__ == "__main__":
    key = jax.random.PRNGKey(0)
    k_par, k_state, k_x0, k_noise = jax.random.split(key, 4)

    params = init_params(k_par)

    # inputs (the torch.randn / randn_like draws are precomputed deterministically)
    state = jax.random.normal(k_state, (BATCH, STATE_DIM), jnp.float32)
    x_init = jax.random.normal(k_x0, (BATCH, ACTION_DIM), jnp.float32)
    step_noise = jax.random.normal(k_noise, (N_TIMESTEPS, BATCH, ACTION_DIM), jnp.float32)

    coef_rows = make_schedule_coeffs(N_TIMESTEPS)   # compile-time Python constants
    tembs = time_embeddings(params, N_TIMESTEPS)    # (T, T_DIM)

    action = diffusion_sample(state, x_init, step_noise, coef_rows, tembs, params)
    action = jax.block_until_ready(action)

    assert action.shape == (BATCH, ACTION_DIM)
    assert bool(jnp.all(jnp.isfinite(action)))
    assert bool(jnp.all(jnp.abs(action) <= MAX_ACTION + 1e-6))
    print("KERNEL_OK")
</pallas_src>

<mosaic_0001>
module attributes {stable_mosaic.version = 11 : i64} {
  func.func @diffusion_kernel(%arg0: memref<6x8x8xf32, #tpu.memory_space<vmem>>, %arg1: memref<5x8x32xf32, #tpu.memory_space<vmem>>, %arg2: memref<88x32xf32, #tpu.memory_space<vmem>>, %arg3: memref<8x8xf32, #tpu.memory_space<vmem>>) attributes {dimension_semantics = [], scalar_prefetch = 0 : i64, scratch_operands = 0 : i64, tpu.core_type = #tpu.core_type<tc>} {
    %c0 = arith.constant 0 : index
    %c0_0 = arith.constant 0 : index
    %0 = vector.load %arg2[%c0, %c0_0] : memref<88x32xf32, #tpu.memory_space<vmem>>, vector<8x32xf32>
    %c8 = arith.constant 8 : index
    %c0_1 = arith.constant 0 : index
    %1 = vector.load %arg2[%c8, %c0_1] : memref<88x32xf32, #tpu.memory_space<vmem>>, vector<32x32xf32>
    %c40 = arith.constant 40 : index
    %c0_2 = arith.constant 0 : index
    %2 = vector.load %arg2[%c40, %c0_2] : memref<88x32xf32, #tpu.memory_space<vmem>>, vector<1x32xf32>
    %c48 = arith.constant 48 : index
    %c0_3 = arith.constant 0 : index
    %3 = vector.load %arg2[%c48, %c0_3] : memref<88x32xf32, #tpu.memory_space<vmem>>, vector<32x8xf32>
    %c80 = arith.constant 80 : index
    %c0_4 = arith.constant 0 : index
    %4 = vector.load %arg2[%c80, %c0_4] : memref<88x32xf32, #tpu.memory_space<vmem>>, vector<1x8xf32>
    %c0_5 = arith.constant 0 : index
    %c0_6 = arith.constant 0 : index
    %c0_7 = arith.constant 0 : index
    %5 = vector.load %arg0[%c0_5, %c0_6, %c0_7] : memref<6x8x8xf32, #tpu.memory_space<vmem>>, vector<1x8x8xf32>
    %6 = vector.shape_cast %5 : vector<1x8x8xf32> to vector<8x8xf32>
    %cst = arith.constant dense<0.000000e+00> : vector<8x32xf32>
    %7 = tpu.matmul %6, %0, %cst {dimension_numbers = #tpu.dot_dimension_numbers<[1], [0], [0], [1], [0, 0, 1, 1], [], []>} : vector<8x8xf32>, vector<8x32xf32>, vector<8x32xf32> -> vector<8x32xf32>
    %c0_8 = arith.constant 0 : index
    %c0_9 = arith.constant 0 : index
    %c0_10 = arith.constant 0 : index
    %8 = vector.load %arg1[%c0_8, %c0_9, %c0_10] : memref<5x8x32xf32, #tpu.memory_space<vmem>>, vector<1x8x32xf32>
    %9 = vector.shape_cast %8 : vector<1x8x32xf32> to vector<8x32xf32>
    %10 = arith.addf %7, %9 : vector<8x32xf32>
    %cst_11 = arith.constant 2.000000e+01 : f32
    %11 = vector.broadcast %cst_11 : f32 to vector<8x32xf32>
    %12 = arith.minimumf %10, %11 : vector<8x32xf32>
    %13 = math.exp %12 : vector<8x32xf32>
    %cst_12 = arith.constant 2.000000e+00 : f32
    %14 = vector.broadcast %cst_12 : f32 to vector<8x32xf32>
    %15 = arith.addf %13, %14 : vector<8x32xf32>
    %16 = arith.mulf %13, %15 : vector<8x32xf32>
    %17 = arith.mulf %10, %16 : vector<8x32xf32>
    %cst_13 = arith.constant 2.000000e+00 : f32
    %18 = vector.broadcast %cst_13 : f32 to vector<8x32xf32>
    %19 = arith.addf %16, %18 : vector<8x32xf32>
    %20 = tpu.reciprocal %19 {approx = true} : vector<8x32xf32> -> vector<8x32xf32>
    %21 = arith.mulf %17, %20 : vector<8x32xf32>
    %cst_14 = arith.constant dense<0.000000e+00> : vector<8x32xf32>
    %22 = tpu.matmul %21, %1, %cst_14 {dimension_numbers = #tpu.dot_dimension_numbers<[1], [0], [0], [1], [0, 0, 1, 1], [], []>} : vector<8x32xf32>, vector<32x32xf32>, vector<8x32xf32> -> vector<8x32xf32>
    %23 = vector.broadcast %2 : vector<1x32xf32> to vector<8x32xf32>
    %24 = arith.addf %22, %23 : vector<8x32xf32>
    %cst_15 = arith.constant 2.000000e+01 : f32
    %25 = vector.broadcast %cst_15 : f32 to vector<8x32xf32>
    %26 = arith.minimumf %24, %25 : vector<8x32xf32>
    %27 = math.exp %26 : vector<8x32xf32>
    %cst_16 = arith.constant 2.000000e+00 : f32
    %28 = vector.broadcast %cst_16 : f32 to vector<8x32xf32>
    %29 = arith.addf %27, %28 : vector<8x32xf32>
    %30 = arith.mulf %27, %29 : vector<8x32xf32>
    %31 = arith.mulf %24, %30 : vector<8x32xf32>
    %cst_17 = arith.constant 2.000000e+00 : f32
    %32 = vector.broadcast %cst_17 : f32 to vector<8x32xf32>
    %33 = arith.addf %30, %32 : vector<8x32xf32>
    %34 = tpu.reciprocal %33 {approx = true} : vector<8x32xf32> -> vector<8x32xf32>
    %35 = arith.mulf %31, %34 : vector<8x32xf32>
    %cst_18 = arith.constant dense<0.000000e+00> : vector<8x8xf32>
    %36 = tpu.matmul %35, %3, %cst_18 {dimension_numbers = #tpu.dot_dimension_numbers<[1], [0], [0], [1], [0, 0, 1, 1], [], []>} : vector<8x32xf32>, vector<32x8xf32>, vector<8x8xf32> -> vector<8x8xf32>
    %37 = vector.broadcast %4 : vector<1x8xf32> to vector<8x8xf32>
    %38 = arith.addf %36, %37 : vector<8x8xf32>
    %cst_19 = arith.constant -1.000000e+00 : f32
    %cst_20 = arith.constant 1.000000e+00 : f32
    %39 = vector.broadcast %cst_19 : f32 to vector<8x8xf32>
    %40 = arith.maximumf %39, %38 : vector<8x8xf32>
    %41 = vector.broadcast %cst_20 : f32 to vector<8x8xf32>
    %42 = arith.minimumf %41, %40 : vector<8x8xf32>
    %cst_21 = arith.constant 0.165653661 : f32
    %43 = vector.broadcast %cst_21 : f32 to vector<8x8xf32>
    %44 = arith.mulf %43, %42 : vector<8x8xf32>
    %cst_22 = arith.constant 0.392901331 : f32
    %45 = vector.broadcast %cst_22 : f32 to vector<8x8xf32>
    %46 = arith.mulf %45, %6 : vector<8x8xf32>
    %47 = arith.addf %44, %46 : vector<8x8xf32>
    %c1 = arith.constant 1 : index
    %c0_23 = arith.constant 0 : index
    %c0_24 = arith.constant 0 : index
    %48 = vector.load %arg0[%c1, %c0_23, %c0_24] : memref<6x8x8xf32, #tpu.memory_space<vmem>>, vector<1x8x8xf32>
    %49 = vector.shape_cast %48 : vector<1x8x8xf32> to vector<8x8xf32>
    %cst_25 = arith.constant 0.898758113 : f32
    %50 = vector.broadcast %cst_25 : f32 to vector<8x8xf32>
    %51 = arith.mulf %50, %49 : vector<8x8xf32>
    %52 = arith.addf %47, %51 : vector<8x8xf32>
    %cst_26 = arith.constant dense<0.000000e+00> : vector<8x32xf32>
    %53 = tpu.matmul %52, %0, %cst_26 {dimension_numbers = #tpu.dot_dimension_numbers<[1], [0], [0], [1], [0, 0, 1, 1], [], []>} : vector<8x8xf32>, vector<8x32xf32>, vector<8x32xf32> -> vector<8x32xf32>
    %c1_27 = arith.constant 1 : index
    %c0_28 = arith.constant 0 : index
    %c0_29 = arith.constant 0 : index
    %54 = vector.load %arg1[%c1_27, %c0_28, %c0_29] : memref<5x8x32xf32, #tpu.memory_space<vmem>>, vector<1x8x32xf32>
    %55 = vector.shape_cast %54 : vector<1x8x32xf32> to vector<8x32xf32>
    %56 = arith.addf %53, %55 : vector<8x32xf32>
    %cst_30 = arith.constant 2.000000e+01 : f32
    %57 = vector.broadcast %cst_30 : f32 to vector<8x32xf32>
    %58 = arith.minimumf %56, %57 : vector<8x32xf32>
    %59 = math.exp %58 : vector<8x32xf32>
    %cst_31 = arith.constant 2.000000e+00 : f32
    %60 = vector.broadcast %cst_31 : f32 to vector<8x32xf32>
    %61 = arith.addf %59, %60 : vector<8x32xf32>
    %62 = arith.mulf %59, %61 : vector<8x32xf32>
    %63 = arith.mulf %56, %62 : vector<8x32xf32>
    %cst_32 = arith.constant 2.000000e+00 : f32
    %64 = vector.broadcast %cst_32 : f32 to vector<8x32xf32>
    %65 = arith.addf %62, %64 : vector<8x32xf32>
    %66 = tpu.reciprocal %65 {approx = true} : vector<8x32xf32> -> vector<8x32xf32>
    %67 = arith.mulf %63, %66 : vector<8x32xf32>
    %cst_33 = arith.constant dense<0.000000e+00> : vector<8x32xf32>
    %68 = tpu.matmul %67, %1, %cst_33 {dimension_numbers = #tpu.dot_dimension_numbers<[1], [0], [0], [1], [0, 0, 1, 1], [], []>} : vector<8x32xf32>, vector<32x32xf32>, vector<8x32xf32> -> vector<8x32xf32>
    %69 = vector.broadcast %2 : vector<1x32xf32> to vector<8x32xf32>
    %70 = arith.addf %68, %69 : vector<8x32xf32>
    %cst_34 = arith.constant 2.000000e+01 : f32
    %71 = vector.broadcast %cst_34 : f32 to vector<8x32xf32>
    %72 = arith.minimumf %70, %71 : vector<8x32xf32>
    %73 = math.exp %72 : vector<8x32xf32>
    %cst_35 = arith.constant 2.000000e+00 : f32
    %74 = vector.broadcast %cst_35 : f32 to vector<8x32xf32>
    %75 = arith.addf %73, %74 : vector<8x32xf32>
    %76 = arith.mulf %73, %75 : vector<8x32xf32>
    %77 = arith.mulf %70, %76 : vector<8x32xf32>
    %cst_36 = arith.constant 2.000000e+00 : f32
    %78 = vector.broadcast %cst_36 : f32 to vector<8x32xf32>
    %79 = arith.addf %76, %78 : vector<8x32xf32>
    %80 = tpu.reciprocal %79 {approx = true} : vector<8x32xf32> -> vector<8x32xf32>
    %81 = arith.mulf %77, %80 : vector<8x32xf32>
    %cst_37 = arith.constant dense<0.000000e+00> : vector<8x8xf32>
    %82 = tpu.matmul %81, %3, %cst_37 {dimension_numbers = #tpu.dot_dimension_numbers<[1], [0], [0], [1], [0, 0, 1, 1], [], []>} : vector<8x32xf32>, vector<32x8xf32>, vector<8x8xf32> -> vector<8x8xf32>
    %83 = vector.broadcast %4 : vector<1x8xf32> to vector<8x8xf32>
    %84 = arith.addf %82, %83 : vector<8x8xf32>
    %cst_38 = arith.constant -1.000000e+00 : f32
    %cst_39 = arith.constant 1.000000e+00 : f32
    %85 = vector.broadcast %cst_38 : f32 to vector<8x8xf32>
    %86 = arith.maximumf %85, %84 : vector<8x8xf32>
    %87 = vector.broadcast %cst_39 : f32 to vector<8x8xf32>
    %88 = arith.minimumf %87, %86 : vector<8x8xf32>
    %cst_40 = arith.constant 0.31268087 : f32
    %89 = vector.broadcast %cst_40 : f32 to vector<8x8xf32>
    %90 = arith.mulf %89, %88 : vector<8x8xf32>
    %cst_41 = arith.constant 0.43346566 : f32
    %91 = vector.broadcast %cst_41 : f32 to vector<8x8xf32>
    %92 = arith.mulf %91, %52 : vector<8x8xf32>
    %93 = arith.addf %90, %92 : vector<8x8xf32>
    %c2 = arith.constant 2 : index
    %c0_42 = arith.constant 0 : index
    %c0_43 = arith.constant 0 : index
    %94 = vector.load %arg0[%c2, %c0_42, %c0_43] : memref<6x8x8xf32, #tpu.memory_space<vmem>>, vector<1x8x8xf32>
    %95 = vector.shape_cast %94 : vector<1x8x8xf32> to vector<8x8xf32>
    %cst_44 = arith.constant 0.812962114 : f32
    %96 = vector.broadcast %cst_44 : f32 to vector<8x8xf32>
    %97 = arith.mulf %96, %95 : vector<8x8xf32>
    %98 = arith.addf %93, %97 : vector<8x8xf32>
    %cst_45 = arith.constant dense<0.000000e+00> : vector<8x32xf32>
    %99 = tpu.matmul %98, %0, %cst_45 {dimension_numbers = #tpu.dot_dimension_numbers<[1], [0], [0], [1], [0, 0, 1, 1], [], []>} : vector<8x8xf32>, vector<8x32xf32>, vector<8x32xf32> -> vector<8x32xf32>
    %c2_46 = arith.constant 2 : index
    %c0_47 = arith.constant 0 : index
    %c0_48 = arith.constant 0 : index
    %100 = vector.load %arg1[%c2_46, %c0_47, %c0_48] : memref<5x8x32xf32, #tpu.memory_space<vmem>>, vector<1x8x32xf32>
    %101 = vector.shape_cast %100 : vector<1x8x32xf32> to vector<8x32xf32>
    %102 = arith.addf %99, %101 : vector<8x32xf32>
    %cst_49 = arith.constant 2.000000e+01 : f32
    %103 = vector.broadcast %cst_49 : f32 to vector<8x32xf32>
    %104 = arith.minimumf %102, %103 : vector<8x32xf32>
    %105 = math.exp %104 : vector<8x32xf32>
    %cst_50 = arith.constant 2.000000e+00 : f32
    %106 = vector.broadcast %cst_50 : f32 to vector<8x32xf32>
    %107 = arith.addf %105, %106 : vector<8x32xf32>
    %108 = arith.mulf %105, %107 : vector<8x32xf32>
    %109 = arith.mulf %102, %108 : vector<8x32xf32>
    %cst_51 = arith.constant 2.000000e+00 : f32
    %110 = vector.broadcast %cst_51 : f32 to vector<8x32xf32>
    %111 = arith.addf %108, %110 : vector<8x32xf32>
    %112 = tpu.reciprocal %111 {approx = true} : vector<8x32xf32> -> vector<8x32xf32>
    %113 = arith.mulf %109, %112 : vector<8x32xf32>
    %cst_52 = arith.constant dense<0.000000e+00> : vector<8x32xf32>
    %114 = tpu.matmul %113, %1, %cst_52 {dimension_numbers = #tpu.dot_dimension_numbers<[1], [0], [0], [1], [0, 0, 1, 1], [], []>} : vector<8x32xf32>, vector<32x32xf32>, vector<8x32xf32> -> vector<8x32xf32>
    %115 = vector.broadcast %2 : vector<1x32xf32> to vector<8x32xf32>
    %116 = arith.addf %114, %115 : vector<8x32xf32>
    %cst_53 = arith.constant 2.000000e+01 : f32
    %117 = vector.broadcast %cst_53 : f32 to vector<8x32xf32>
    %118 = arith.minimumf %116, %117 : vector<8x32xf32>
    %119 = math.exp %118 : vector<8x32xf32>
    %cst_54 = arith.constant 2.000000e+00 : f32
    %120 = vector.broadcast %cst_54 : f32 to vector<8x32xf32>
    %121 = arith.addf %119, %120 : vector<8x32xf32>
    %122 = arith.mulf %119, %121 : vector<8x32xf32>
    %123 = arith.mulf %116, %122 : vector<8x32xf32>
    %cst_55 = arith.constant 2.000000e+00 : f32
    %124 = vector.broadcast %cst_55 : f32 to vector<8x32xf32>
    %125 = arith.addf %122, %124 : vector<8x32xf32>
    %126 = tpu.reciprocal %125 {approx = true} : vector<8x32xf32> -> vector<8x32xf32>
    %127 = arith.mulf %123, %126 : vector<8x32xf32>
    %cst_56 = arith.constant dense<0.000000e+00> : vector<8x8xf32>
    %128 = tpu.matmul %127, %3, %cst_56 {dimension_numbers = #tpu.dot_dimension_numbers<[1], [0], [0], [1], [0, 0, 1, 1], [], []>} : vector<8x32xf32>, vector<32x8xf32>, vector<8x8xf32> -> vector<8x8xf32>
    %129 = vector.broadcast %4 : vector<1x8xf32> to vector<8x8xf32>
    %130 = arith.addf %128, %129 : vector<8x8xf32>
    %cst_57 = arith.constant -1.000000e+00 : f32
    %cst_58 = arith.constant 1.000000e+00 : f32
    %131 = vector.broadcast %cst_57 : f32 to vector<8x8xf32>
    %132 = arith.maximumf %131, %130 : vector<8x8xf32>
    %133 = vector.broadcast %cst_58 : f32 to vector<8x8xf32>
    %134 = arith.minimumf %133, %132 : vector<8x8xf32>
    %cst_59 = arith.constant 0.498410285 : f32
    %135 = vector.broadcast %cst_59 : f32 to vector<8x8xf32>
    %136 = arith.mulf %135, %134 : vector<8x8xf32>
    %cst_60 = arith.constant 0.405078113 : f32
    %137 = vector.broadcast %cst_60 : f32 to vector<8x8xf32>
    %138 = arith.mulf %137, %98 : vector<8x8xf32>
    %139 = arith.addf %136, %138 : vector<8x8xf32>
    %c3 = arith.constant 3 : index
    %c0_61 = arith.constant 0 : index
    %c0_62 = arith.constant 0 : index
    %140 = vector.load %arg0[%c3, %c0_61, %c0_62] : memref<6x8x8xf32, #tpu.memory_space<vmem>>, vector<1x8x8xf32>
    %141 = vector.shape_cast %140 : vector<1x8x8xf32> to vector<8x8xf32>
    %cst_63 = arith.constant 0.653254687 : f32
    %142 = vector.broadcast %cst_63 : f32 to vector<8x8xf32>
    %143 = arith.mulf %142, %141 : vector<8x8xf32>
    %144 = arith.addf %139, %143 : vector<8x8xf32>
    %cst_64 = arith.constant dense<0.000000e+00> : vector<8x32xf32>
    %145 = tpu.matmul %144, %0, %cst_64 {dimension_numbers = #tpu.dot_dimension_numbers<[1], [0], [0], [1], [0, 0, 1, 1], [], []>} : vector<8x8xf32>, vector<8x32xf32>, vector<8x32xf32> -> vector<8x32xf32>
    %c3_65 = arith.constant 3 : index
    %c0_66 = arith.constant 0 : index
    %c0_67 = arith.constant 0 : index
    %146 = vector.load %arg1[%c3_65, %c0_66, %c0_67] : memref<5x8x32xf32, #tpu.memory_space<vmem>>, vector<1x8x32xf32>
    %147 = vector.shape_cast %146 : vector<1x8x32xf32> to vector<8x32xf32>
    %148 = arith.addf %145, %147 : vector<8x32xf32>
    %cst_68 = arith.constant 2.000000e+01 : f32
    %149 = vector.broadcast %cst_68 : f32 to vector<8x32xf32>
    %150 = arith.minimumf %148, %149 : vector<8x32xf32>
    %151 = math.exp %150 : vector<8x32xf32>
    %cst_69 = arith.constant 2.000000e+00 : f32
    %152 = vector.broadcast %cst_69 : f32 to vector<8x32xf32>
    %153 = arith.addf %151, %152 : vector<8x32xf32>
    %154 = arith.mulf %151, %153 : vector<8x32xf32>
    %155 = arith.mulf %148, %154 : vector<8x32xf32>
    %cst_70 = arith.constant 2.000000e+00 : f32
    %156 = vector.broadcast %cst_70 : f32 to vector<8x32xf32>
    %157 = arith.addf %154, %156 : vector<8x32xf32>
    %158 = tpu.reciprocal %157 {approx = true} : vector<8x32xf32> -> vector<8x32xf32>
    %159 = arith.mulf %155, %158 : vector<8x32xf32>
    %cst_71 = arith.constant dense<0.000000e+00> : vector<8x32xf32>
    %160 = tpu.matmul %159, %1, %cst_71 {dimension_numbers = #tpu.dot_dimension_numbers<[1], [0], [0], [1], [0, 0, 1, 1], [], []>} : vector<8x32xf32>, vector<32x32xf32>, vector<8x32xf32> -> vector<8x32xf32>
    %161 = vector.broadcast %2 : vector<1x32xf32> to vector<8x32xf32>
    %162 = arith.addf %160, %161 : vector<8x32xf32>
    %cst_72 = arith.constant 2.000000e+01 : f32
    %163 = vector.broadcast %cst_72 : f32 to vector<8x32xf32>
    %164 = arith.minimumf %162, %163 : vector<8x32xf32>
    %165 = math.exp %164 : vector<8x32xf32>
    %cst_73 = arith.constant 2.000000e+00 : f32
    %166 = vector.broadcast %cst_73 : f32 to vector<8x32xf32>
    %167 = arith.addf %165, %166 : vector<8x32xf32>
    %168 = arith.mulf %165, %167 : vector<8x32xf32>
    %169 = arith.mulf %162, %168 : vector<8x32xf32>
    %cst_74 = arith.constant 2.000000e+00 : f32
    %170 = vector.broadcast %cst_74 : f32 to vector<8x32xf32>
    %171 = arith.addf %168, %170 : vector<8x32xf32>
    %172 = tpu.reciprocal %171 {approx = true} : vector<8x32xf32> -> vector<8x32xf32>
    %173 = arith.mulf %169, %172 : vector<8x32xf32>
    %cst_75 = arith.constant dense<0.000000e+00> : vector<8x8xf32>
    %174 = tpu.matmul %173, %3, %cst_75 {dimension_numbers = #tpu.dot_dimension_numbers<[1], [0], [0], [1], [0, 0, 1, 1], [], []>} : vector<8x32xf32>, vector<32x8xf32>, vector<8x8xf32> -> vector<8x8xf32>
    %175 = vector.broadcast %4 : vector<1x8xf32> to vector<8x8xf32>
    %176 = arith.addf %174, %175 : vector<8x8xf32>
    %cst_76 = arith.constant -1.000000e+00 : f32
    %cst_77 = arith.constant 1.000000e+00 : f32
    %177 = vector.broadcast %cst_76 : f32 to vector<8x8xf32>
    %178 = arith.maximumf %177, %176 : vector<8x8xf32>
    %179 = vector.broadcast %cst_77 : f32 to vector<8x8xf32>
    %180 = arith.minimumf %179, %178 : vector<8x8xf32>
    %cst_78 = arith.constant 0.728435278 : f32
    %181 = vector.broadcast %cst_78 : f32 to vector<8x8xf32>
    %182 = arith.mulf %181, %180 : vector<8x8xf32>
    %cst_79 = arith.constant 0.255116224 : f32
    %183 = vector.broadcast %cst_79 : f32 to vector<8x8xf32>
    %184 = arith.mulf %183, %144 : vector<8x8xf32>
    %185 = arith.addf %182, %184 : vector<8x8xf32>
    %c4 = arith.constant 4 : index
    %c0_80 = arith.constant 0 : index
    %c0_81 = arith.constant 0 : index
    %186 = vector.load %arg0[%c4, %c0_80, %c0_81] : memref<6x8x8xf32, #tpu.memory_space<vmem>>, vector<1x8x8xf32>
    %187 = vector.shape_cast %186 : vector<1x8x8xf32> to vector<8x8xf32>
    %cst_82 = arith.constant 0.398890376 : f32
    %188 = vector.broadcast %cst_82 : f32 to vector<8x8xf32>
    %189 = arith.mulf %188, %187 : vector<8x8xf32>
    %190 = arith.addf %185, %189 : vector<8x8xf32>
    %cst_83 = arith.constant dense<0.000000e+00> : vector<8x32xf32>
    %191 = tpu.matmul %190, %0, %cst_83 {dimension_numbers = #tpu.dot_dimension_numbers<[1], [0], [0], [1], [0, 0, 1, 1], [], []>} : vector<8x8xf32>, vector<8x32xf32>, vector<8x32xf32> -> vector<8x32xf32>
    %c4_84 = arith.constant 4 : index
    %c0_85 = arith.constant 0 : index
    %c0_86 = arith.constant 0 : index
    %192 = vector.load %arg1[%c4_84, %c0_85, %c0_86] : memref<5x8x32xf32, #tpu.memory_space<vmem>>, vector<1x8x32xf32>
    %193 = vector.shape_cast %192 : vector<1x8x32xf32> to vector<8x32xf32>
    %194 = arith.addf %191, %193 : vector<8x32xf32>
    %cst_87 = arith.constant 2.000000e+01 : f32
    %195 = vector.broadcast %cst_87 : f32 to vector<8x32xf32>
    %196 = arith.minimumf %194, %195 : vector<8x32xf32>
    %197 = math.exp %196 : vector<8x32xf32>
    %cst_88 = arith.constant 2.000000e+00 : f32
    %198 = vector.broadcast %cst_88 : f32 to vector<8x32xf32>
    %199 = arith.addf %197, %198 : vector<8x32xf32>
    %200 = arith.mulf %197, %199 : vector<8x32xf32>
    %201 = arith.mulf %194, %200 : vector<8x32xf32>
    %cst_89 = arith.constant 2.000000e+00 : f32
    %202 = vector.broadcast %cst_89 : f32 to vector<8x32xf32>
    %203 = arith.addf %200, %202 : vector<8x32xf32>
    %204 = tpu.reciprocal %203 {approx = true} : vector<8x32xf32> -> vector<8x32xf32>
    %205 = arith.mulf %201, %204 : vector<8x32xf32>
    %cst_90 = arith.constant dense<0.000000e+00> : vector<8x32xf32>
    %206 = tpu.matmul %205, %1, %cst_90 {dimension_numbers = #tpu.dot_dimension_numbers<[1], [0], [0], [1], [0, 0, 1, 1], [], []>} : vector<8x32xf32>, vector<32x32xf32>, vector<8x32xf32> -> vector<8x32xf32>
    %207 = vector.broadcast %2 : vector<1x32xf32> to vector<8x32xf32>
    %208 = arith.addf %206, %207 : vector<8x32xf32>
    %cst_91 = arith.constant 2.000000e+01 : f32
    %209 = vector.broadcast %cst_91 : f32 to vector<8x32xf32>
    %210 = arith.minimumf %208, %209 : vector<8x32xf32>
    %211 = math.exp %210 : vector<8x32xf32>
    %cst_92 = arith.constant 2.000000e+00 : f32
    %212 = vector.broadcast %cst_92 : f32 to vector<8x32xf32>
    %213 = arith.addf %211, %212 : vector<8x32xf32>
    %214 = arith.mulf %211, %213 : vector<8x32xf32>
    %215 = arith.mulf %208, %214 : vector<8x32xf32>
    %cst_93 = arith.constant 2.000000e+00 : f32
    %216 = vector.broadcast %cst_93 : f32 to vector<8x32xf32>
    %217 = arith.addf %214, %216 : vector<8x32xf32>
    %218 = tpu.reciprocal %217 {approx = true} : vector<8x32xf32> -> vector<8x32xf32>
    %219 = arith.mulf %215, %218 : vector<8x32xf32>
    %cst_94 = arith.constant dense<0.000000e+00> : vector<8x8xf32>
    %220 = tpu.matmul %219, %3, %cst_94 {dimension_numbers = #tpu.dot_dimension_numbers<[1], [0], [0], [1], [0, 0, 1, 1], [], []>} : vector<8x32xf32>, vector<32x8xf32>, vector<8x8xf32> -> vector<8x8xf32>
    %221 = vector.broadcast %4 : vector<1x8xf32> to vector<8x8xf32>
    %222 = arith.addf %220, %221 : vector<8x8xf32>
    %cst_95 = arith.constant -1.000000e+00 : f32
    %cst_96 = arith.constant 1.000000e+00 : f32
    %223 = vector.broadcast %cst_95 : f32 to vector<8x8xf32>
    %224 = arith.maximumf %223, %222 : vector<8x8xf32>
    %225 = vector.broadcast %cst_96 : f32 to vector<8x8xf32>
    %226 = arith.minimumf %225, %224 : vector<8x8xf32>
    %cst_97 = arith.constant 1.000000e+00 : f32
    %227 = vector.broadcast %cst_97 : f32 to vector<8x8xf32>
    %228 = arith.mulf %227, %226 : vector<8x8xf32>
    %cst_98 = arith.constant 0.000000e+00 : f32
    %229 = vector.broadcast %cst_98 : f32 to vector<8x8xf32>
    %230 = arith.mulf %229, %190 : vector<8x8xf32>
    %231 = arith.addf %228, %230 : vector<8x8xf32>
    %cst_99 = arith.constant -1.000000e+00 : f32
    %cst_100 = arith.constant 1.000000e+00 : f32
    %232 = vector.broadcast %cst_99 : f32 to vector<8x8xf32>
    %233 = arith.maximumf %232, %231 : vector<8x8xf32>
    %234 = vector.broadcast %cst_100 : f32 to vector<8x8xf32>
    %235 = arith.minimumf %234, %233 : vector<8x8xf32>
    %c0_101 = arith.constant 0 : index
    %c0_102 = arith.constant 0 : index
    %236 = vector.load %arg3[%c0_101, %c0_102] : memref<8x8xf32, #tpu.memory_space<vmem>>, vector<8x8xf32>
    tpu.vector_store %arg3[%c0_101, %c0_102], %235 {strides = array<i32>} : memref<8x8xf32, #tpu.memory_space<vmem>>, vector<8x8xf32>,
    return
  }
}

</mosaic_0001>

<bundles_post_ra>
// kernel: tpu_custom_call.1
= control target key start
LH: loop header
LB: loop body
LE: loop exit
PB: predicated region body
PF: predicated region fallthrough
CT: control target
= control target key end

     0   :  { %vm28_vm0 = vcmask 64512   ;;  %v1579_v2 = vmov 0.0   ;;  %vm1580_vm1 = vmmov 0   ;;  %s1840_s0 = inlined_call_operand.vmem [shape: f32[6,8,8], index: 0, kind: input, shape index: {}]   ;;  %s1841_s1 = inlined_call_operand.vmem [shape: f32[5,8,32], index: 1, kind: input, shape index: {}]   ;;  %s1842_s2 = inlined_call_operand.vmem [shape: f32[88,32], index: 2, kind: input, shape index: {}]   ;;  %s1843_s3 = inlined_call_operand.hbm [shape: f32[8,8], index: 3, kind: output, shape index: {}]  }
   0x1   :  { %v1605_v0 = vld [vmem:[%s1842_s2] sm:$0xff]  ;;  %1379 = vmatprep.subr.mxu0 %v1579_v2  ;;  %1381 = vmatprep.mubr.msk.f32.mxu0 %vm1580_vm1, %v1579_v2 }
   0x2   :  { %v1610_v1 = vld [vmem:[%s1840_s0] sm:$0xff] }
   0x3   :  { %8 = vsyncpa [#allocation3], 0  ;;  %1380 = vmatpush3.msra.mxu0 %v1605_v0  ;;  %1384 = vmatprep.subr.mxu1 %v1579_v2  ;;  %v1627_v3 = vld [vmem:[%s1842_s2 + $0x20] sm:$0xff]  ;;  %v1634_v4 = vld [vmem:[%s1842_s2 + $0x18] sm:$0xff]  ;;  %vm115_vm2 = vcmask 261120  }
   0x4   :  { %1382 = vmatmul.mubr.msk.f32.vlgmr.msra.gmra.mxu0 %vm28_vm0, %v1610_v1  ;;  %1392 = vmatprep.mubr.msk.f32.mxu1 %vm1580_vm1, %v1579_v2  ;;  %v1641_v5 = vld [vmem:[%s1842_s2 + $0x10] sm:$0xff]  ;;  %v1648_v6 = vld [vmem:[%s1842_s2 + $0x8] sm:$0xff]  ;;  %v27_v7 = vld [vmem:[%s1841_s1] sm:$0xff]  ;;  %v278_v42 = vmul.f32 0.39290133, %v1610_v1 }
   0x5   :  { %1395 = vmatprep.subr.mxu0 %v1579_v2  ;;  %1403 = vmatprep.mubr.msk.f32.mxu0 %vm1580_vm1, %v1579_v2  ;;  %v1663_v20 = vld [vmem:[%s1842_s2 + $0x48] sm:$0xff]  ;;  %v1670_v21 = vld [vmem:[%s1842_s2 + $0x40] sm:$0xff]  ;;  %v1677_v22 = vld [vmem:[%s1842_s2 + $0x38] sm:$0xff] }
   0x6   :  { %1385 = vmatpush3.msra.mxu1 %v1627_v3  ;;  %1396 = vmatpush3.msra.mxu0 %v1663_v20  ;;  %v1684_v23 = vld [vmem:[%s1842_s2 + $0x30] sm:$0xff]  ;;  %v1691_v24 = vld [vmem:[%s1842_s2 + $0x28] ss:$0 sm:$0xff] }
   0x7   :  { %1386 = vmatprep.subr.mxu1 %v1579_v2  ;;  %1397 = vmatprep.subr.mxu0 %v1579_v2  ;;  %v1708_v37 = vld [vmem:[%s1842_s2 + $0x50] ss:$0 sm:$0xff]  ;;  %v1294_v40 = vld [vmem:[%s1840_s0 + $0x8] sm:$0xff] }
   0x8   :  { %1387 = vmatpush3.msra.mxu1 %v1634_v4  ;;  %1398 = vmatpush3.msra.mxu0 %v1670_v21  ;;  %v282_v45 = vmul.f32 0.8987581, %v1294_v40  ;;  %v1295_v48 = vld [vmem:[%s1841_s1 + $0x8] sm:$0xff] }
   0x9   :  { %1388 = vmatprep.subr.mxu1 %v1579_v2  ;;  %1399 = vmatprep.subr.mxu0 %v1579_v2 }
   0xa   :  { %1389 = vmatpush3.msra.mxu1 %v1641_v5  ;;  %1400 = vmatpush3.msra.mxu0 %v1677_v22 }
   0xb   :  { %1390 = vmatprep.subr.mxu1 %v1579_v2  ;;  %1401 = vmatprep.subr.mxu0 %v1579_v2 }
   0xc   :  { %1391 = vmatpush3.msra.mxu1 %v1648_v6  ;;  %1402 = vmatpush3.msra.mxu0 %v1684_v23 }
   0xd   :  { %1406 = vmatprep.subr.mxu1 %v1579_v2  ;;  %1411 = vmatprep.subr.mxu0 %v1579_v2 }
  0xc4   :  { %v98_v8 = vpop.f32.mrf.mxu0 }
  0xc5   :  { %v99_v9 = vadd.f32 %v98_v8, %v27_v7 }
  0xc6   :  { %v1383_v10 = vpop.f32.mrf.mxu0 }
  0xc7   :  { %v102_v11 = vmin.f32 %v99_v9, 20.0 }
  0xc9   :  { %v103_v12 = vmul.f32 1.442695, %v102_v11 }
  0xcb   :  { %1517 = vpow2.f32 %v103_v12 }
  0xd8   :  { %v1518_v13 = vpop.eup %1517 }
  0xd9   :  { %v105_v14 = vadd.f32 2.0, %v1518_v13 }
  0xdb   :  { %v106_v15 = vmul.f32 %v1518_v13, %v105_v14 }
  0xdd   :  { %v108_v16 = vadd.f32 2.0, %v106_v15  ;;  %v107_v17 = vmul.f32 %v106_v15, %v99_v9 }
  0xdf   :  { %1519 = vrcp.f32 %v108_v16 }
  0xec   :  { %v1520_v18 = vpop.eup %1519 }
  0xed   :  { %v110_v19 = vmul.f32 %v1520_v18, %v107_v17  ;;  %v1300_v17 = vld [vmem:[%s1840_s0 + $0x10] sm:$0xff] }
  0xef   :  { %1393 = vmatmul.mubr.msk.f32.vlgmr.msra.gmra.mxu1 %vm115_vm2, %v110_v19 }
  0xf0   :  { %1407 = vmatpush3.msra.mxu1 %v1605_v0  ;;  %1408 = vmatprep.mubr.msk.f32.mxu1 %vm1580_vm1, %v1579_v2 }
  0xf1   :  { %1422 = vmatprep.subr.mxu1 %v1579_v2 }
 0x1af   :  { %v185_v25 = vpop.f32.mrf.mxu1 }
 0x1b0   :  { %v186_v26 = vadd.f32 %v1691_v24, %v185_v25 }
 0x1b1   :  { %v1394_v27 = vpop.f32.mrf.mxu1 }
 0x1b2   :  { %v189_v28 = vmin.f32 %v186_v26, 20.0  ;;  %v530_v27 = vmul.f32 0.8129621, %v1300_v17 }
 0x1b4   :  { %v190_v29 = vmul.f32 1.442695, %v189_v28 }
 0x1b6   :  { %1521 = vpow2.f32 %v190_v29 }
 0x1c3   :  { %v1522_v30 = vpop.eup %1521 }
 0x1c4   :  { %v192_v31 = vadd.f32 2.0, %v1522_v30 }
 0x1c6   :  { %v193_v32 = vmul.f32 %v1522_v30, %v192_v31  ;;  %v1301_v30 = vld [vmem:[%s1841_s1 + $0x10] sm:$0xff] }
 0x1c8   :  { %v195_v33 = vadd.f32 2.0, %v193_v32  ;;  %v194_v34 = vmul.f32 %v193_v32, %v186_v26 }
 0x1ca   :  { %1523 = vrcp.f32 %v195_v33 }
 0x1d7   :  { %v1524_v35 = vpop.eup %1523 }
 0x1d8   :  { %v197_v36 = vmul.f32 %v1524_v35, %v194_v34 }
 0x1da   :  { %1404 = vmatmul.mubr.msk.f32.vlgmr.msra.gmra.mxu0 %vm115_vm2, %v197_v36 }
 0x1db   :  { %1412 = vmatpush3.msra.mxu0 %v1627_v3  ;;  %1419 = vmatprep.mubr.msk.f32.mxu0 %vm1580_vm1, %v1579_v2 }
 0x1dc   :  { %1413 = vmatprep.subr.mxu0 %v1579_v2 }
 0x1dd   :  { %1414 = vmatpush3.msra.mxu0 %v1634_v4 }
 0x1de   :  { %1415 = vmatprep.subr.mxu0 %v1579_v2 }
 0x1df   :  { %1416 = vmatpush3.msra.mxu0 %v1641_v5 }
 0x1e0   :  { %1417 = vmatprep.subr.mxu0 %v1579_v2 }
 0x1e1   :  { %1418 = vmatpush3.msra.mxu0 %v1648_v6 }
 0x1e2   :  { %1433 = vmatprep.subr.mxu0 %v1579_v2 }
 0x29a   :  { %v271_v38 = vpop.f32.mrf.mxu0 }
 0x29b   :  { %v272_v39 = vadd.f32 %v1708_v37, %v271_v38 }
 0x29c   :  { %v1405_v41 = vpop.f32.mrf.mxu0 }
 0x29d   :  { %v1293_v43 = vclamps-f32 %v272_v39, 1.0 }
 0x29f   :  { %v277_v44 = vmul.f32 0.16565366, %v1293_v43 }
 0x2a1   :  { %v279_v46 = vadd.f32 %v278_v42, %v277_v44 }
 0x2a3   :  { %v283_v47 = vadd.f32 %v282_v45, %v279_v46 }
 0x2a5   :  { %1409 = vmatmul.mubr.msk.f32.vlgmr.msra.gmra.mxu1 %vm28_vm0, %v283_v47  ;;  %v526_v26 = vmul.f32 0.43346566, %v283_v47 }
 0x2a6   :  { %1423 = vmatpush3.msra.mxu1 %v1663_v20  ;;  %1430 = vmatprep.mubr.msk.f32.mxu1 %vm1580_vm1, %v1579_v2 }
 0x2a7   :  { %1424 = vmatprep.subr.mxu1 %v1579_v2 }
 0x2a8   :  { %1425 = vmatpush3.msra.mxu1 %v1670_v21 }
 0x2a9   :  { %1426 = vmatprep.subr.mxu1 %v1579_v2 }
 0x2aa   :  { %1427 = vmatpush3.msra.mxu1 %v1677_v22 }
 0x2ab   :  { %1428 = vmatprep.subr.mxu1 %v1579_v2 }
 0x2ac   :  { %1429 = vmatpush3.msra.mxu1 %v1684_v23 }
 0x2ad   :  { %1438 = vmatprep.subr.mxu1 %v1579_v2 }
 0x365   :  { %v355_v49 = vpop.f32.mrf.mxu1 }
 0x366   :  { %v356_v50 = vadd.f32 %v1295_v48, %v355_v49 }
 0x367   :  { %v1410_v51 = vpop.f32.mrf.mxu1 }
 0x368   :  { %v359_v52 = vmin.f32 %v356_v50, 20.0 }
 0x36a   :  { %v360_v53 = vmul.f32 1.442695, %v359_v52 }
 0x36c   :  { %1525 = vpow2.f32 %v360_v53 }
 0x379   :  { %v1526_v54 = vpop.eup %1525 }
 0x37a   :  { %v362_v55 = vadd.f32 2.0, %v1526_v54 }
 0x37c   :  { %v363_v56 = vmul.f32 %v1526_v54, %v362_v55 }
 0x37e   :  { %v365_v57 = vadd.f32 2.0, %v363_v56  ;;  %v364_v58 = vmul.f32 %v363_v56, %v356_v50 }
 0x380   :  { %1527 = vrcp.f32 %v365_v57 }
 0x38d   :  { %v1528_v59 = vpop.eup %1527 }
 0x38e   :  { %v367_v60 = vmul.f32 %v1528_v59, %v364_v58  ;;  %v1306_v58 = vld [vmem:[%s1840_s0 + $0x18] sm:$0xff] }
 0x390   :  { %1420 = vmatmul.mubr.msk.f32.vlgmr.msra.gmra.mxu0 %vm115_vm2, %v367_v60 }
 0x391   :  { %1434 = vmatpush3.msra.mxu0 %v1605_v0  ;;  %1435 = vmatprep.mubr.msk.f32.mxu0 %vm1580_vm1, %v1579_v2 }
 0x392   :  { %1449 = vmatprep.subr.mxu0 %v1579_v2 }
 0x450   :  { %v437_v61 = vpop.f32.mrf.mxu0 }
 0x451   :  { %v438_v62 = vadd.f32 %v1691_v24, %v437_v61 }
 0x452   :  { %v1421_v63 = vpop.f32.mrf.mxu0 }
 0x453   :  { %v441_v1 = vmin.f32 %v438_v62, 20.0  ;;  %v778_v63 = vmul.f32 0.6532547, %v1306_v58 }
 0x455   :  { %v442_v7 = vmul.f32 1.442695, %v441_v1 }
 0x457   :  { %1529 = vpow2.f32 %v442_v7 }
 0x464   :  { %v1530_v8 = vpop.eup %1529 }
 0x465   :  { %v444_v9 = vadd.f32 2.0, %v1530_v8 }
 0x467   :  { %v445_v10 = vmul.f32 %v1530_v8, %v444_v9  ;;  %v1307_v8 = vld [vmem:[%s1841_s1 + $0x18] sm:$0xff] }
 0x469   :  { %v447_v11 = vadd.f32 2.0, %v445_v10  ;;  %v446_v12 = vmul.f32 %v445_v10, %v438_v62 }
 0x46b   :  { %1531 = vrcp.f32 %v447_v11 }
 0x478   :  { %v1532_v13 = vpop.eup %1531 }
 0x479   :  { %v449_v14 = vmul.f32 %v1532_v13, %v446_v12 }
 0x47b   :  { %1431 = vmatmul.mubr.msk.f32.vlgmr.msra.gmra.mxu1 %vm115_vm2, %v449_v14 }
 0x47c   :  { %1439 = vmatpush3.msra.mxu1 %v1627_v3  ;;  %1446 = vmatprep.mubr.msk.f32.mxu1 %vm1580_vm1, %v1579_v2 }
 0x47d   :  { %1440 = vmatprep.subr.mxu1 %v1579_v2 }
 0x47e   :  { %1441 = vmatpush3.msra.mxu1 %v1634_v4 }
 0x47f   :  { %1442 = vmatprep.subr.mxu1 %v1579_v2 }
 0x480   :  { %1443 = vmatpush3.msra.mxu1 %v1641_v5 }
 0x481   :  { %1444 = vmatprep.subr.mxu1 %v1579_v2 }
 0x482   :  { %1445 = vmatpush3.msra.mxu1 %v1648_v6 }
 0x483   :  { %1460 = vmatprep.subr.mxu1 %v1579_v2 }
 0x53b   :  { %v519_v15 = vpop.f32.mrf.mxu1 }
 0x53c   :  { %v520_v16 = vadd.f32 %v1708_v37, %v519_v15 }
 0x53d   :  { %v1432_v18 = vpop.f32.mrf.mxu1 }
 0x53e   :  { %v1299_v19 = vclamps-f32 %v520_v16, 1.0 }
 0x540   :  { %v525_v25 = vmul.f32 0.31268087, %v1299_v19 }
 0x542   :  { %v527_v28 = vadd.f32 %v526_v26, %v525_v25 }
 0x544   :  { %v531_v29 = vadd.f32 %v530_v27, %v527_v28 }
 0x546   :  { %1436 = vmatmul.mubr.msk.f32.vlgmr.msra.gmra.mxu0 %vm28_vm0, %v531_v29  ;;  %v774_v62 = vmul.f32 0.4050781, %v531_v29 }
 0x547   :  { %1450 = vmatpush3.msra.mxu0 %v1663_v20  ;;  %1457 = vmatprep.mubr.msk.f32.mxu0 %vm1580_vm1, %v1579_v2 }
 0x548   :  { %1451 = vmatprep.subr.mxu0 %v1579_v2 }
 0x549   :  { %1452 = vmatpush3.msra.mxu0 %v1670_v21 }
 0x54a   :  { %1453 = vmatprep.subr.mxu0 %v1579_v2 }
 0x54b   :  { %1454 = vmatpush3.msra.mxu0 %v1677_v22 }
 0x54c   :  { %1455 = vmatprep.subr.mxu0 %v1579_v2 }
 0x54d   :  { %1456 = vmatpush3.msra.mxu0 %v1684_v23 }
 0x54e   :  { %1465 = vmatprep.subr.mxu0 %v1579_v2 }
 0x606   :  { %v603_v31 = vpop.f32.mrf.mxu0 }
 0x607   :  { %v604_v32 = vadd.f32 %v1301_v30, %v603_v31 }
 0x608   :  { %v1437_v33 = vpop.f32.mrf.mxu0 }
 0x609   :  { %v607_v34 = vmin.f32 %v604_v32, 20.0 }
 0x60b   :  { %v608_v35 = vmul.f32 1.442695, %v607_v34 }
 0x60d   :  { %1533 = vpow2.f32 %v608_v35 }
 0x61a   :  { %v1534_v36 = vpop.eup %1533 }
 0x61b   :  { %v610_v38 = vadd.f32 2.0, %v1534_v36 }
 0x61d   :  { %v611_v39 = vmul.f32 %v1534_v36, %v610_v38 }
 0x61f   :  { %v613_v40 = vadd.f32 2.0, %v611_v39  ;;  %v612_v41 = vmul.f32 %v611_v39, %v604_v32 }
 0x621   :  { %1535 = vrcp.f32 %v613_v40 }
 0x62e   :  { %v1536_v42 = vpop.eup %1535 }
 0x62f   :  { %v615_v43 = vmul.f32 %v1536_v42, %v612_v41 }
 0x631   :  { %1447 = vmatmul.mubr.msk.f32.vlgmr.msra.gmra.mxu1 %vm115_vm2, %v615_v43 }
 0x632   :  { %1461 = vmatpush3.msra.mxu1 %v1605_v0  ;;  %1462 = vmatprep.mubr.msk.f32.mxu1 %vm1580_vm1, %v1579_v2 }
 0x633   :  { %1476 = vmatprep.subr.mxu1 %v1579_v2 }
 0x6f1   :  { %v685_v44 = vpop.f32.mrf.mxu1 }
 0x6f2   :  { %v686_v45 = vadd.f32 %v1691_v24, %v685_v44 }
 0x6f3   :  { %v1448_v46 = vpop.f32.mrf.mxu1 }
 0x6f4   :  { %v689_v47 = vmin.f32 %v686_v45, 20.0 }
 0x6f6   :  { %v690_v48 = vmul.f32 1.442695, %v689_v47 }
 0x6f8   :  { %1537 = vpow2.f32 %v690_v48 }
 0x705   :  { %v1538_v49 = vpop.eup %1537 }
 0x706   :  { %v692_v50 = vadd.f32 2.0, %v1538_v49 }
 0x708   :  { %v693_v51 = vmul.f32 %v1538_v49, %v692_v50 }
 0x70a   :  { %v695_v52 = vadd.f32 2.0, %v693_v51  ;;  %v694_v53 = vmul.f32 %v693_v51, %v686_v45 }
 0x70c   :  { %1539 = vrcp.f32 %v695_v52 }
 0x719   :  { %v1540_v54 = vpop.eup %1539 }
 0x71a   :  { %v697_v55 = vmul.f32 %v1540_v54, %v694_v53 }
 0x71c   :  { %1458 = vmatmul.mubr.msk.f32.vlgmr.msra.gmra.mxu0 %vm115_vm2, %v697_v55 }
 0x71d   :  { %1466 = vmatpush3.msra.mxu0 %v1627_v3  ;;  %1473 = vmatprep.mubr.msk.f32.mxu0 %vm1580_vm1, %v1579_v2 }
 0x71e   :  { %1467 = vmatprep.subr.mxu0 %v1579_v2 }
 0x71f   :  { %1468 = vmatpush3.msra.mxu0 %v1634_v4 }
 0x720   :  { %1469 = vmatprep.subr.mxu0 %v1579_v2 }
 0x721   :  { %1470 = vmatpush3.msra.mxu0 %v1641_v5 }
 0x722   :  { %1471 = vmatprep.subr.mxu0 %v1579_v2 }
 0x723   :  { %1472 = vmatpush3.msra.mxu0 %v1648_v6 }
 0x724   :  { %1487 = vmatprep.subr.mxu0 %v1579_v2 }
 0x7dc   :  { %v767_v56 = vpop.f32.mrf.mxu0 }
 0x7dd   :  { %v768_v57 = vadd.f32 %v1708_v37, %v767_v56 }
 0x7de   :  { %v1459_v59 = vpop.f32.mrf.mxu0 }
 0x7df   :  { %v1305_v60 = vclamps-f32 %v768_v57, 1.0 }
 0x7e1   :  { %v773_v61 = vmul.f32 0.49841028, %v1305_v60 }
 0x7e3   :  { %v775_v1 = vadd.f32 %v774_v62, %v773_v61 }
 0x7e5   :  { %v779_v7 = vadd.f32 %v778_v63, %v775_v1 }
 0x7e7   :  { %1463 = vmatmul.mubr.msk.f32.vlgmr.msra.gmra.mxu1 %vm28_vm0, %v779_v7  ;;  %v1022_v43 = vmul.f32 0.25511622, %v779_v7 }
 0x7e8   :  { %1477 = vmatpush3.msra.mxu1 %v1663_v20  ;;  %1484 = vmatprep.mubr.msk.f32.mxu1 %vm1580_vm1, %v1579_v2 }
 0x7e9   :  { %1478 = vmatprep.subr.mxu1 %v1579_v2 }
 0x7ea   :  { %1479 = vmatpush3.msra.mxu1 %v1670_v21 }
 0x7eb   :  { %1480 = vmatprep.subr.mxu1 %v1579_v2 }
 0x7ec   :  { %1481 = vmatpush3.msra.mxu1 %v1677_v22 }
 0x7ed   :  { %1482 = vmatprep.subr.mxu1 %v1579_v2 }
 0x7ee   :  { %1483 = vmatpush3.msra.mxu1 %v1684_v23 }
 0x7ef   :  { %1492 = vmatprep.subr.mxu1 %v1579_v2 }
 0x8a7   :  { %v851_v9 = vpop.f32.mrf.mxu1 }
 0x8a8   :  { %v852_v10 = vadd.f32 %v1307_v8, %v851_v9 }
 0x8a9   :  { %v1464_v11 = vpop.f32.mrf.mxu1 }
 0x8aa   :  { %v855_v12 = vmin.f32 %v852_v10, 20.0 }
 0x8ac   :  { %v856_v13 = vmul.f32 1.442695, %v855_v12 }
 0x8ae   :  { %1541 = vpow2.f32 %v856_v13 }
 0x8bb   :  { %v1542_v14 = vpop.eup %1541 }
 0x8bc   :  { %v858_v15 = vadd.f32 2.0, %v1542_v14 }
 0x8be   :  { %v859_v16 = vmul.f32 %v1542_v14, %v858_v15 }
 0x8c0   :  { %v861_v17 = vadd.f32 2.0, %v859_v16  ;;  %v860_v18 = vmul.f32 %v859_v16, %v852_v10 }
 0x8c2   :  { %1543 = vrcp.f32 %v861_v17 }
 0x8cf   :  { %v1544_v19 = vpop.eup %1543 }
 0x8d0   :  { %v863_v25 = vmul.f32 %v1544_v19, %v860_v18 }
 0x8d2   :  { %1474 = vmatmul.mubr.msk.f32.vlgmr.msra.gmra.mxu0 %vm115_vm2, %v863_v25 }
 0x8d3   :  { %1488 = vmatpush3.msra.mxu0 %v1605_v0  ;;  %1489 = vmatprep.mubr.msk.f32.mxu0 %vm1580_vm1, %v1579_v2 }
 0x8d4   :  { %1503 = vmatprep.subr.mxu0 %v1579_v2 }
 0x992   :  { %v933_v26 = vpop.f32.mrf.mxu0 }
 0x993   :  { %v934_v27 = vadd.f32 %v1691_v24, %v933_v26 }
 0x994   :  { %v1475_v28 = vpop.f32.mrf.mxu0 }
 0x995   :  { %v937_v29 = vmin.f32 %v934_v27, 20.0 }
 0x997   :  { %v938_v30 = vmul.f32 1.442695, %v937_v29 }
 0x999   :  { %1545 = vpow2.f32 %v938_v30 }
 0x9a6   :  { %v1546_v31 = vpop.eup %1545 }
 0x9a7   :  { %v940_v32 = vadd.f32 2.0, %v1546_v31 }
 0x9a9   :  { %v941_v33 = vmul.f32 %v1546_v31, %v940_v32 }
 0x9ab   :  { %v943_v34 = vadd.f32 2.0, %v941_v33  ;;  %v942_v35 = vmul.f32 %v941_v33, %v934_v27 }
 0x9ad   :  { %1547 = vrcp.f32 %v943_v34 }
 0x9ba   :  { %v1548_v36 = vpop.eup %1547 }
 0x9bb   :  { %v945_v0 = vmul.f32 %v1548_v36, %v942_v35 }
 0x9bd   :  { %1485 = vmatmul.mubr.msk.f32.vlgmr.msra.gmra.mxu1 %vm115_vm2, %v945_v0 }
 0x9be   :  { %1493 = vmatpush3.msra.mxu1 %v1627_v3  ;;  %1500 = vmatprep.mubr.msk.f32.mxu1 %vm1580_vm1, %v1579_v2  ;;  %v1312_v3 = vld [vmem:[%s1840_s0 + $0x20] sm:$0xff] }
 0x9bf   :  { %1494 = vmatprep.subr.mxu1 %v1579_v2 }
 0x9c0   :  { %1495 = vmatpush3.msra.mxu1 %v1634_v4  ;;  %v1026_v4 = vmul.f32 0.39889038, %v1312_v3 }
 0x9c1   :  { %1496 = vmatprep.subr.mxu1 %v1579_v2 }
 0x9c2   :  { %1497 = vmatpush3.msra.mxu1 %v1641_v5  ;;  %v1313_v5 = vld [vmem:[%s1841_s1 + $0x20] sm:$0xff]  ;;  %s1581_s1 = smov [#allocation2]  }
 0x9c3   :  { %1498 = vmatprep.subr.mxu1 %v1579_v2  ;;  %s1280_s25 = sshll.u32 %s1581_s1, 4  ;;  %s1281_s25 = int_to_ptr.vmem [resolvable:$true] %s1280_s25 }
 0x9c4   :  { %1499 = vmatpush3.msra.mxu1 %v1648_v6  ;;  %s1557_s26 = scalar_lea.vmem %s1281_s25, 128  ;;  %p1562_p1 = scmp.lt.s32.totalorder %s1281_s25, %s1281_s25 }
 0x9c5   :  { %p1558_p0 = scmp.ne.s32.totalorder %s1281_s25, %s1557_s26  ;;  %p1563_p2 = scmp.lt.s32.totalorder %s1557_s26, %s1557_s26 }
 0x9c7   :  { %p1564_p3 = por %p1563_p2, %p1562_p1 }
 0x9c9   :  { %p1565_p4 = pnand %p1564_p3, %p1558_p0 }
 0xa7d   :  { %v1015_v38 = vpop.f32.mrf.mxu1 }
 0xa7e   :  { %v1016_v39 = vadd.f32 %v1708_v37, %v1015_v38 }
 0xa7f   :  { %v1486_v40 = vpop.f32.mrf.mxu1 }
 0xa80   :  { %v1311_v41 = vclamps-f32 %v1016_v39, 1.0 }
 0xa82   :  { %v1021_v42 = vmul.f32 0.7284353, %v1311_v41 }
 0xa84   :  { %v1023_v44 = vadd.f32 %v1022_v43, %v1021_v42 }
 0xa86   :  { %v1027_v45 = vadd.f32 %v1026_v4, %v1023_v44 }
 0xa88   :  { %1490 = vmatmul.mubr.msk.f32.vlgmr.msra.gmra.mxu0 %vm28_vm0, %v1027_v45 }
 0xa89   :  { %1504 = vmatpush3.msra.mxu0 %v1663_v20  ;;  %1511 = vmatprep.mubr.msk.f32.mxu0 %vm1580_vm1, %v1579_v2 }
 0xa8a   :  { %1505 = vmatprep.subr.mxu0 %v1579_v2 }
 0xa8b   :  { %1506 = vmatpush3.msra.mxu0 %v1670_v21 }
 0xa8c   :  { %1507 = vmatprep.subr.mxu0 %v1579_v2 }
 0xa8d   :  { %1508 = vmatpush3.msra.mxu0 %v1677_v22 }
 0xa8e   :  { %1509 = vmatprep.subr.mxu0 %v1579_v2 }
 0xa8f   :  { %1510 = vmatpush3.msra.mxu0 %v1684_v23 }
 0xb48   :  { %v1099_v6 = vpop.f32.mrf.mxu0 }
 0xb49   :  { %v1100_v20 = vadd.f32 %v1313_v5, %v1099_v6 }
 0xb4a   :  { %v1491_v46 = vpop.f32.mrf.mxu0 }
 0xb4b   :  { %v1103_v47 = vmin.f32 %v1100_v20, 20.0 }
 0xb4d   :  { %v1104_v48 = vmul.f32 1.442695, %v1103_v47 }
 0xb4f   :  { %1549 = vpow2.f32 %v1104_v48 }
 0xb5c   :  { %v1550_v49 = vpop.eup %1549 }
 0xb5d   :  { %v1106_v21 = vadd.f32 2.0, %v1550_v49 }
 0xb5f   :  { %v1107_v50 = vmul.f32 %v1550_v49, %v1106_v21 }
 0xb61   :  { %v1109_v51 = vadd.f32 2.0, %v1107_v50  ;;  %v1108_v22 = vmul.f32 %v1107_v50, %v1100_v20 }
 0xb63   :  { %1551 = vrcp.f32 %v1109_v51 }
 0xb70   :  { %v1552_v52 = vpop.eup %1551 }
 0xb71   :  { %v1111_v2 = vmul.f32 %v1552_v52, %v1108_v22 }
 0xb73   :  { %1501 = vmatmul.mubr.msk.f32.vlgmr.msra.gmra.mxu1 %vm115_vm2, %v1111_v2 }
 0xc33   :  { %v1181_v23 = vpop.f32.mrf.mxu1 }
 0xc34   :  { %v1182_v53 = vadd.f32 %v1691_v24, %v1181_v23  ;;  %v1269_v24 = vmul.f32 0.0, %v1027_v45 }
 0xc35   :  { %v1502_v54 = vpop.f32.mrf.mxu1 }
 0xc36   :  { %v1185_v55 = vmin.f32 %v1182_v53, 20.0 }
 0xc38   :  { %v1186_v56 = vmul.f32 1.442695, %v1185_v55 }
 0xc3a   :  { %1553 = vpow2.f32 %v1186_v56 }
 0xc47   :  { %v1554_v57 = vpop.eup %1553 }
 0xc48   :  { %v1188_v58 = vadd.f32 2.0, %v1554_v57 }
 0xc4a   :  { %v1189_v59 = vmul.f32 %v1554_v57, %v1188_v58 }
 0xc4c   :  { %v1191_v60 = vadd.f32 2.0, %v1189_v59  ;;  %v1190_v61 = vmul.f32 %v1189_v59, %v1182_v53 }
 0xc4e   :  { %1555 = vrcp.f32 %v1191_v60 }
 0xc5b   :  { %v1556_v62 = vpop.eup %1555 }
 0xc5c   :  { %v1193_v63 = vmul.f32 %v1556_v62, %v1190_v61 }
 0xc5e   :  { %1512 = vmatmul.mubr.msk.f32.vlgmr.msra.gmra.mxu0 %vm115_vm2, %v1193_v63 }
 0xd1e   :  { %v1263_v1 = vpop.f32.mrf.mxu0 }
 0xd1f   :  { %v1264_v7 = vadd.f32 %v1708_v37, %v1263_v1 }
 0xd20   :  { %v1513_v8 = vpop.f32.mrf.mxu0 }
 0xd21   :  { %v1317_v9 = vclamps-f32 %v1264_v7, 1.0 }
 0xd23   :  { %v1270_v10 = vadd.f32 %v1317_v9, %v1269_v24 }
 0xd25   :  { %v1318_v11 = vclamps-f32 %v1270_v10, 1.0 }
 0xd27   :  { %1273 = vst.msk [vmem:[#allocation2] sm:$0xff] %vm28_vm0, %v1318_v11 }
 0xd28   :  { %1568 = shalt.err (!%p1565_p4)
}
 0xd29   :  { %1283 = dma.vmem_to_hbm [thread:$0]  %s1281_s25, 128, %s1843_s3, [#allocation3]  }
 0xd2a   :  { %1577 = dma.done.wait [#allocation3], 128  }
 0xd2b   :  { %1578 = vsyncadd [#allocation3], 4294967168 }
 0xd2c   :  { %1287 = vsyncpa [#allocation3], 1 }

</bundles_post_ra>
